<compile_context>
chip_gen: v5e
topology: v5e:2x2
jax: 0.10.0
libtpu: 0.0.40
codegen_flags: <defaults>
</compile_context>

<pallas_src>
import jax
import jax.numpy as jnp
from jax.experimental import pallas as pl
from jax.experimental.pallas import tpu as pltpu


def _relu_kernel(x_ref, o_ref):
    # Pure elementwise max(x, 0) on the whole VMEM tile (VPU work).
    o_ref[...] = jnp.maximum(x_ref[...], jnp.zeros((), dtype=x_ref.dtype))


def relu_pallas(x: jax.Array) -> jax.Array:
    """ReLU(x) with identical shape/dtype semantics to torch.nn.functional.relu."""
    orig_shape = x.shape
    dtype = x.dtype
    n = x.size
    if n == 0:
        return x

    itemsize = jnp.dtype(dtype).itemsize
    # Min sublane multiple per dtype: 8 (f32), 16 (bf16/f16), 32 (int8/fp8).
    sublane = max(8, 32 // itemsize)

    # Pick the widest lane-dense last dim the tensor can support
    # (wider last dim => larger contiguous DMA rows, biggest mem-bound lever).
    lane = None
    for cand in (1024, 512, 256, 128):
        if n >= sublane * cand:
            lane = cand
            break
    if lane is None:
        # Tensor smaller than one minimal tile: not worth a kernel launch.
        return jnp.maximum(x, jnp.zeros((), dtype=dtype))

    flat = jnp.ravel(x)
    chunk = sublane * lane
    n_main = (n // chunk) * chunk          # aligned prefix handled by the kernel
    rows = n_main // lane                  # multiple of `sublane` by construction
    x2d = flat[:n_main].reshape(rows, lane)  # pure reshape, no extra HBM pass

    # ~1 MiB blocks: ~85%+ of HBM roofline, fits all generations' VMEM budgets.
    target_block_bytes = 1 << 20
    tile_rows = (target_block_bytes // (lane * itemsize)) // sublane * sublane
    tile_rows = max(sublane, min(rows, tile_rows))
    grid = (pl.cdiv(rows, tile_rows),)

    out2d = pl.pallas_call(
        _relu_kernel,
        out_shape=jax.ShapeDtypeStruct((rows, lane), dtype),
        grid_spec=pltpu.PrefetchScalarGridSpec(
            num_scalar_prefetch=0,
            grid=grid,
            in_specs=[pl.BlockSpec((tile_rows, lane), lambda i: (i, 0))],
            out_specs=pl.BlockSpec((tile_rows, lane), lambda i: (i, 0)),
        ),
        compiler_params=pltpu.CompilerParams(
            dimension_semantics=("parallel",),
        ),
        cost_estimate=pl.CostEstimate(
            flops=n_main,
            transcendentals=0,
            bytes_accessed=2 * n_main * itemsize,
        ),
    )(x2d)

    out_main = out2d.reshape(-1)
    if n_main == n:
        return out_main.reshape(orig_shape)
    # Tiny unaligned tail (< sublane*lane elements): plain jnp path.
    tail = jnp.maximum(flat[n_main:], jnp.zeros((), dtype=dtype))
    return jnp.concatenate([out_main, tail]).reshape(orig_shape)


if __name__ == "__main__":
    key = jax.random.PRNGKey(0)

    # Primary check: NCHW input, batch=2, channels=4, spatial=16x16 (f32).
    x = jax.random.normal(key, (2, 4, 16, 16), dtype=jnp.float32)
    y = jax.block_until_ready(relu_pallas(x))
    y_ref = jnp.maximum(x, 0.0)
    assert y.shape == x.shape and y.dtype == x.dtype
    assert jnp.allclose(y, y_ref), "ReLU kernel mismatch (aligned f32)"

    # Secondary check: size not divisible by sublane*lane -> exercises the
    # aligned-prefix kernel + tiny jnp tail path.
    x2 = jax.random.normal(jax.random.PRNGKey(1), (2, 4, 17, 17), dtype=jnp.float32)
    y2 = jax.block_until_ready(relu_pallas(x2))
    assert y2.shape == x2.shape and y2.dtype == x2.dtype
    assert jnp.allclose(y2, jnp.maximum(x2, 0.0)), "ReLU kernel mismatch (tail path)"

    print("KERNEL_OK")
</pallas_src>

<mosaic_0001>
module attributes {stable_mosaic.version = 11 : i64} {
  func.func @_relu_kernel(%arg0: i32, %arg1: memref<8x256xf32, #tpu.memory_space<vmem>>, %arg2: memref<8x256xf32, #tpu.memory_space<vmem>>) attributes {dimension_semantics = [#tpu.dimension_semantics<parallel>], iteration_bounds = array<i64: 1>, scalar_prefetch = 0 : i64, scratch_operands = 0 : i64, tpu.core_type = #tpu.core_type<tc>, window_params = [{transform_indices = @transform_0, window_bounds = array<i64: 8, 256>}, {transform_indices = @transform_1, window_bounds = array<i64: 8, 256>}]} {
    %c0 = arith.constant 0 : index
    %c0_0 = arith.constant 0 : index
    %0 = vector.load %arg1[%c0, %c0_0] : memref<8x256xf32, #tpu.memory_space<vmem>>, vector<8x256xf32>
    %cst = arith.constant 0.000000e+00 : f32
    %1 = vector.broadcast %cst : f32 to vector<8x256xf32>
    %2 = arith.maximumf %0, %1 : vector<8x256xf32>
    %c0_1 = arith.constant 0 : index
    %c0_2 = arith.constant 0 : index
    %3 = vector.load %arg2[%c0_1, %c0_2] : memref<8x256xf32, #tpu.memory_space<vmem>>, vector<8x256xf32>
    tpu.vector_store %arg2[%c0_1, %c0_2], %2 {strides = array<i32>} : memref<8x256xf32, #tpu.memory_space<vmem>>, vector<8x256xf32>,
    return
  }
  func.func @transform_0(%arg0: i32) -> (i32, i32) {
    %c0_i32 = arith.constant 0 : i32
    %c0_i32_0 = arith.constant 0 : i32
    return %arg0, %c0_i32 : i32, i32
  }
  func.func @transform_1(%arg0: i32) -> (i32, i32) {
    %c0_i32 = arith.constant 0 : i32
    %c0_i32_0 = arith.constant 0 : i32
    return %arg0, %c0_i32 : i32, i32
  }
}

</mosaic_0001>

<bundles_post_ra>
// kernel: tpu_custom_call.1
= control target key start
LH: loop header
LB: loop body
LE: loop exit
PB: predicated region body
PF: predicated region fallthrough
CT: control target
= control target key end

     0   :  { %6 = vsyncpa [#allocation3], 0  ;;  %s118_s0 = inlined_call_operand.hbm [shape: f32[8,256], index: 0, kind: input, shape index: {}]   ;;  %s119_s1 = inlined_call_operand.hbm [shape: f32[8,256], index: 1, kind: output, shape index: {}]  }
   0x1   :  { %7 = vsyncpa [#allocation4], 0  ;;  %s13_s8 = sshll.u32 %s118_s0, 4  ;;  %s100_s9 = smov [#allocation2]   ;;  %s14_s8 = int_to_ptr.hbm [resolvable:$true] %s13_s8 }
   0x2   :  { %s15_s10 = sshll.u32 %s100_s9, 4  ;;  %s16_s10 = int_to_ptr.vmem [resolvable:$true] %s15_s10 }
   0x3   :  { %18 = dma.hbm_to_vmem [thread:$0]  %s14_s8, 256, %s16_s10, [#allocation3]  }
   0x4   :  { %96 = dma.done.wait [#allocation3], 256  }
   0x5   :  { %97 = vsyncadd [#allocation3], 4294967040  ;;  %s101_s11 = smov [#allocation5]   ;;  %s36_s15 = sshll.u32 %s119_s1, 4  ;;  %v23_v0 = vld [vmem:[#allocation2] sm:$0xff]  ;;  %v24_v1 = vld [vmem:[#allocation2 + $0x8] sm:$0xff]  ;;  %s37_s15 = int_to_ptr.hbm [resolvable:$true] %s36_s15 }
   0x6   :  { %s34_s12 = sshll.u32 %s101_s11, 4  ;;  %v25_v2 = vmax.f32 %v23_v0, 0.0  ;;  %v26_v3 = vmax.f32 %v24_v1, 0.0  ;;  %s35_s12 = int_to_ptr.vmem [resolvable:$true] %s34_s12 }
   0x8   :  { %27 = vst [vmem:[#allocation5] sm:$0xff] %v25_v2 }
   0x9   :  { %28 = vst [vmem:[#allocation5 + $0x8] sm:$0xff] %v26_v3 }
   0xa   :  { %39 = dma.vmem_to_hbm [thread:$0]  %s35_s12, 256, %s37_s15, [#allocation4]  }
   0xb   :  { %98 = dma.done.wait [#allocation4], 256  }
   0xc   :  { %99 = vsyncadd [#allocation4], 4294967040 }
   0xd   :  { %44 = vsyncpa [#allocation3], 1 }
   0xe   :  { %45 = vsyncpa [#allocation4], 1 }

</bundles_post_ra>
